<compile_context>
chip_gen: v7x
topology: tpu7x:2x2x1
jax: 0.10.0
libtpu: 0.0.40
codegen_flags: <defaults>
</compile_context>

<pallas_src>
import functools

import jax
import jax.numpy as jnp
from jax.experimental import pallas as pl
from jax.experimental.pallas import tpu as pltpu

_LOG_CLAMP = -100.0   # nn.BCELoss clamps log terms at -100
_SMOOTH = 1e-6
_LANES = 128
_SUBLANES = 8


def _bce_dice_kernel(p_ref, t_ref, out_ref, *,
                     tile_rows, sub_rows, valid_rows, need_mask):
    c = pl.program_id(0)          # parallel chunk axis
    s = pl.program_id(1)          # arbitrary (reduction) axis

    @pl.when(s == 0)
    def _():
        out_ref[...] = jnp.zeros_like(out_ref)

    n_steps = pl.num_programs(1)
    row0 = (c * n_steps + s) * tile_rows          # global row of this tile
    n_sub = tile_rows // sub_rows                 # static

    def accumulate(mask):
        # Process the tile in sub_rows-row slices so live f32 temporaries stay
        # ~sub_rows*128*4 bytes each instead of tile_rows*128*4.
        def body(i, carry):
            acc_bce, acc_pt, acc_sum = carry
            r = pl.multiple_of(i * sub_rows, sub_rows)
            p = p_ref[pl.ds(r, sub_rows), :].astype(jnp.float32)
            t = t_ref[pl.ds(r, sub_rows), :].astype(jnp.float32)
            if mask:
                # Zero out rows past the real data (ragged last tile or
                # clamped-duplicate tiles).  Applied BEFORE the log so OOB
                # garbage never reaches a transcendental.
                row_ids = (row0 + r) + jax.lax.broadcasted_iota(
                    jnp.int32, (sub_rows, _LANES), 0)
                valid = row_ids < valid_rows
                p = jnp.where(valid, p, 0.0)
                t = jnp.where(valid, t, 0.0)
            # BCE with one log1p per element (exact for binary targets):
            #   t=1: -clamp(log(p))   = -clamp(log1p(p-1))
            #   t=0: -clamp(log(1-p)) = -clamp(log1p(-p))
            z = jnp.where(t > 0.5, p - 1.0, -p)
            bce = -jnp.maximum(jnp.log1p(z), _LOG_CLAMP)
            acc_bce = acc_bce + bce.reshape(-1, _SUBLANES, _LANES).sum(axis=0)
            acc_pt = acc_pt + (p * t).reshape(-1, _SUBLANES, _LANES).sum(axis=0)
            acc_sum = acc_sum + (p + t).reshape(-1, _SUBLANES, _LANES).sum(axis=0)
            return acc_bce, acc_pt, acc_sum

        zero = jnp.zeros((_SUBLANES, _LANES), jnp.float32)
        acc_bce, acc_pt, acc_sum = jax.lax.fori_loop(
            0, n_sub, body, (zero, zero, zero), unroll=True)
        out_ref[0, 0] += acc_bce
        out_ref[0, 1] += acc_pt
        out_ref[0, 2] += acc_sum

    if need_mask:
        is_ragged = row0 + tile_rows > valid_rows

        @pl.when(is_ragged)
        def _():
            accumulate(mask=True)

        @pl.when(jnp.logical_not(is_ragged))
        def _():
            accumulate(mask=False)   # fast path: no iota/compare/select
    else:
        accumulate(mask=False)


def _default_n_chunks():
    # v7x has 2 TensorCores/chip -> the "parallel" chunk axis shards across
    # them.  v5e/v6e have a single TC, where chunking is just a serial loop
    # that fragments the reduction -> use 1 there.
    try:
        kind = jax.devices()[0].device_kind.lower()
    except Exception:
        return 2
    return 2 if ("v7" in kind or "7x" in kind) else 1


def bce_dice_loss(preds, targets, *, tile_rows=4096, sub_rows=512, n_chunks=None):
    """preds, targets: same shape (e.g. NCHW); preds in (0,1).

    Targets MUST be binary {0,1} (matching ``targets.int()`` in the module);
    pass them as int8/uint8/bool for minimal HBM traffic -- the f32 cast
    happens on-chip.  The single-log1p BCE used here is exact only for binary
    targets.
    """
    assert preds.shape == targets.shape
    assert sub_rows % _SUBLANES == 0
    n_elems = preds.size
    p_flat = preds.reshape(-1)
    t_flat = targets.reshape(-1)

    # Minimal pad to one (8,128) vreg tile so the data reshapes to a lane-dense
    # 2-D slab.  Zero pads contribute exactly zero to every accumulated sum.
    vreg = _SUBLANES * _LANES
    padded = -(-n_elems // vreg) * vreg
    if padded != n_elems:
        # Rare path (typical CNN shapes have H*W a multiple of 128).
        p_flat = jnp.pad(p_flat, (0, padded - n_elems))
        t_flat = jnp.pad(t_flat, (0, padded - n_elems))

    rows = padded // _LANES                 # multiple of 8
    p2 = p_flat.reshape(rows, _LANES)
    t2 = t_flat.reshape(rows, _LANES)

    # Tile / grid geometry (all static Python ints).
    tile = min(tile_rows, rows)
    if tile >= sub_rows:
        tile = (tile // sub_rows) * sub_rows     # multiple of sub_rows (& of 32)
        sub = sub_rows
    else:
        sub = tile                               # small input: one sub-block
    total_tiles = -(-rows // tile)               # cdiv
    if n_chunks is None:
        n_chunks = _default_n_chunks()
    chunks = max(1, min(n_chunks, total_tiles))
    steps = -(-total_tiles // chunks)            # cdiv
    coverage = chunks * steps
    need_clamp = coverage > total_tiles          # fully-OOB grid points exist
    need_mask = coverage * tile != rows          # any ragged coverage at all

    def in_map(c, s):
        idx = c * steps + s
        if need_clamp:
            idx = jnp.minimum(idx, total_tiles - 1)   # never DMA fully OOB
        return (idx, 0)

    kernel = functools.partial(
        _bce_dice_kernel, tile_rows=tile, sub_rows=sub,
        valid_rows=rows, need_mask=need_mask)

    partials = pl.pallas_call(
        kernel,
        out_shape=jax.ShapeDtypeStruct((chunks, 3, _SUBLANES, _LANES),
                                       jnp.float32),
        grid_spec=pltpu.PrefetchScalarGridSpec(
            num_scalar_prefetch=0,
            grid=(chunks, steps),
            in_specs=[
                pl.BlockSpec((tile, _LANES), in_map),
                pl.BlockSpec((tile, _LANES), in_map),
            ],
            out_specs=pl.BlockSpec((1, 3, _SUBLANES, _LANES),
                                   lambda c, s: (c, 0, 0, 0)),
        ),
        compiler_params=pltpu.CompilerParams(
            dimension_semantics=("parallel", "arbitrary")),
    )(p2, t2)

    # Tiny epilogue in plain XLA: cross-lane/chunk reduction + final scalars.
    sums = jnp.sum(partials, axis=(0, 2, 3))   # (3,)=[sum bce, sum p*t, sum p+t]
    bce_mean = sums[0] / jnp.float32(n_elems)
    dice = (2.0 * sums[1] + _SMOOTH) / (sums[2] + _SMOOTH)
    return bce_mean + (1.0 - dice)


def _reference(preds, targets):
    p = preds.astype(jnp.float32)
    t = targets.astype(jnp.float32)
    logp = jnp.maximum(jnp.log(p), _LOG_CLAMP)
    log1mp = jnp.maximum(jnp.log1p(-p), _LOG_CLAMP)
    bce = jnp.mean(-(t * logp + (1.0 - t) * log1mp))
    dice = (2.0 * jnp.sum(p * t) + _SMOOTH) / (jnp.sum(p) + jnp.sum(t) + _SMOOTH)
    return bce + (1.0 - dice)


if __name__ == "__main__":
    key = jax.random.PRNGKey(0)
    k1, k2 = jax.random.split(key)

    B, C, H, W = 2, 4, 16, 16   # NCHW, same convention as the PyTorch module
    logits = jax.random.normal(k1, (B, C, H, W), dtype=jnp.float32)
    preds = jax.nn.sigmoid(logits)                       # preds in (0, 1)
    # Binary labels as int8 -> 1 B/element of HBM traffic for targets.
    targets = (jax.random.uniform(k2, (B, C, H, W)) > 0.5).astype(jnp.int8)

    loss = jax.block_until_ready(bce_dice_loss(preds, targets))

    ref = _reference(preds, targets.astype(jnp.float32))
    assert jnp.allclose(loss, ref, rtol=1e-5, atol=1e-5), (loss, ref)

    print("KERNEL_OK")
</pallas_src>

<mosaic_0001>
module attributes {stable_mosaic.version = 11 : i64} {
  func.func @_bce_dice_kernel(%arg0: i32, %arg1: i32, %arg2: memref<16x128xf32, #tpu.memory_space<vmem>>, %arg3: memref<16x128xi8, #tpu.memory_space<vmem>>, %arg4: memref<1x3x8x128xf32, #tpu.memory_space<vmem>>) attributes {dimension_semantics = [#tpu.dimension_semantics<parallel>, #tpu.dimension_semantics<arbitrary>], iteration_bounds = array<i64: 1, 1>, scalar_prefetch = 0 : i64, scratch_operands = 0 : i64, tpu.core_type = #tpu.core_type<tc>, window_params = [{transform_indices = @transform_0, window_bounds = array<i64: 16, 128>}, {transform_indices = @transform_1, window_bounds = array<i64: 16, 128>}, {transform_indices = @transform_2, window_bounds = array<i64: 1, 3, 8, 128>}]} {
    %c0_i32 = arith.constant 0 : i32
    %0 = arith.cmpi eq, %arg1, %c0_i32 : i32
    %1 = arith.extui %0 : i1 to i32
    %c0_i32_0 = arith.constant 0 : i32
    %2 = arith.cmpi ne, %1, %c0_i32_0 : i32
    scf.if %2 {
      %cst_33 = arith.constant 0.000000e+00 : f32
      %52 = vector.broadcast %cst_33 : f32 to vector<1x3x8x128xf32>
      %c0_34 = arith.constant 0 : index
      %c0_35 = arith.constant 0 : index
      %c0_36 = arith.constant 0 : index
      %c0_37 = arith.constant 0 : index
      %53 = vector.load %arg4[%c0_34, %c0_35, %c0_36, %c0_37] : memref<1x3x8x128xf32, #tpu.memory_space<vmem>>, vector<1x3x8x128xf32>
      tpu.vector_store %arg4[%c0_34, %c0_35, %c0_36, %c0_37], %52 {strides = array<i32>} : memref<1x3x8x128xf32, #tpu.memory_space<vmem>>, vector<1x3x8x128xf32>,
    } else {
    }
    %cst = arith.constant 0.000000e+00 : f32
    %3 = vector.broadcast %cst : f32 to vector<8x128xf32>
    %c0_i32_1 = arith.constant 0 : i32
    %c16_i32 = arith.constant 16 : i32
    %4 = arith.muli %c0_i32_1, %c16_i32 : i32
    %5 = tpu.assume_multiple %4, 16 : i32
    %6 = arith.index_cast %5 : i32 to index
    %c0 = arith.constant 0 : index
    %7 = vector.load %arg2[%6, %c0] : memref<16x128xf32, #tpu.memory_space<vmem>>, vector<16x128xf32>
    %8 = arith.index_cast %5 : i32 to index
    %c0_2 = arith.constant 0 : index
    %9 = vector.load %arg3[%8, %c0_2] : memref<16x128xi8, #tpu.memory_space<vmem>>, vector<16x128xi8>
    %10 = arith.sitofp %9 : vector<16x128xi8> to vector<16x128xf32>
    %cst_3 = arith.constant 5.000000e-01 : f32
    %11 = vector.broadcast %cst_3 : f32 to vector<16x128xf32>
    %12 = arith.cmpf ogt, %10, %11 : vector<16x128xf32>
    %cst_4 = arith.constant 1.000000e+00 : f32
    %13 = vector.broadcast %cst_4 : f32 to vector<16x128xf32>
    %14 = arith.subf %7, %13 : vector<16x128xf32>
    %cst_5 = arith.constant 0.000000e+00 : f32
    %15 = vector.broadcast %cst_5 : f32 to vector<16x128xf32>
    %16 = arith.subf %15, %7 : vector<16x128xf32>
    %17 = arith.select %12, %14, %16 : vector<16x128xi1>, vector<16x128xf32>
    %18 = math.log1p %17 : vector<16x128xf32>
    %cst_6 = arith.constant -1.000000e+02 : f32
    %19 = vector.broadcast %cst_6 : f32 to vector<16x128xf32>
    %20 = arith.maximumf %18, %19 : vector<16x128xf32>
    %cst_7 = arith.constant 0.000000e+00 : f32
    %21 = vector.broadcast %cst_7 : f32 to vector<16x128xf32>
    %22 = arith.subf %21, %20 : vector<16x128xf32>
    %23 = vector.shape_cast %22 : vector<16x128xf32> to vector<2x8x128xf32>
    %cst_8 = arith.constant dense<0.000000e+00> : vector<8x128xf32>
    %24 = vector.multi_reduction <add>, %23, %cst_8 [0] : vector<2x8x128xf32> to vector<8x128xf32>
    %25 = arith.addf %3, %24 : vector<8x128xf32>
    %26 = arith.mulf %7, %10 : vector<16x128xf32>
    %27 = vector.shape_cast %26 : vector<16x128xf32> to vector<2x8x128xf32>
    %cst_9 = arith.constant dense<0.000000e+00> : vector<8x128xf32>
    %28 = vector.multi_reduction <add>, %27, %cst_9 [0] : vector<2x8x128xf32> to vector<8x128xf32>
    %29 = arith.addf %3, %28 : vector<8x128xf32>
    %30 = arith.addf %7, %10 : vector<16x128xf32>
    %31 = vector.shape_cast %30 : vector<16x128xf32> to vector<2x8x128xf32>
    %cst_10 = arith.constant dense<0.000000e+00> : vector<8x128xf32>
    %32 = vector.multi_reduction <add>, %31, %cst_10 [0] : vector<2x8x128xf32> to vector<8x128xf32>
    %33 = arith.addf %3, %32 : vector<8x128xf32>
    %c1_i32 = arith.constant 1 : i32
    %c0_11 = arith.constant 0 : index
    %c0_12 = arith.constant 0 : index
    %c0_13 = arith.constant 0 : index
    %c0_14 = arith.constant 0 : index
    %34 = vector.load %arg4[%c0_11, %c0_12, %c0_13, %c0_14] : memref<1x3x8x128xf32, #tpu.memory_space<vmem>>, vector<1x1x8x128xf32>
    %35 = vector.shape_cast %34 : vector<1x1x8x128xf32> to vector<8x128xf32>
    %36 = arith.addf %35, %25 : vector<8x128xf32>
    %c0_15 = arith.constant 0 : index
    %c0_16 = arith.constant 0 : index
    %c0_17 = arith.constant 0 : index
    %c0_18 = arith.constant 0 : index
    %37 = vector.load %arg4[%c0_15, %c0_16, %c0_17, %c0_18] : memref<1x3x8x128xf32, #tpu.memory_space<vmem>>, vector<1x1x8x128xf32>
    %38 = vector.shape_cast %37 : vector<1x1x8x128xf32> to vector<8x128xf32>
    %39 = vector.shape_cast %36 : vector<8x128xf32> to vector<1x1x8x128xf32>
    tpu.vector_store %arg4[%c0_15, %c0_16, %c0_17, %c0_18], %39 {strides = array<i32>} : memref<1x3x8x128xf32, #tpu.memory_space<vmem>>, vector<1x1x8x128xf32>,
    %c0_19 = arith.constant 0 : index
    %c1 = arith.constant 1 : index
    %c0_20 = arith.constant 0 : index
    %c0_21 = arith.constant 0 : index
    %40 = vector.load %arg4[%c0_19, %c1, %c0_20, %c0_21] : memref<1x3x8x128xf32, #tpu.memory_space<vmem>>, vector<1x1x8x128xf32>
    %41 = vector.shape_cast %40 : vector<1x1x8x128xf32> to vector<8x128xf32>
    %42 = arith.addf %41, %29 : vector<8x128xf32>
    %c0_22 = arith.constant 0 : index
    %c1_23 = arith.constant 1 : index
    %c0_24 = arith.constant 0 : index
    %c0_25 = arith.constant 0 : index
    %43 = vector.load %arg4[%c0_22, %c1_23, %c0_24, %c0_25] : memref<1x3x8x128xf32, #tpu.memory_space<vmem>>, vector<1x1x8x128xf32>
    %44 = vector.shape_cast %43 : vector<1x1x8x128xf32> to vector<8x128xf32>
    %45 = vector.shape_cast %42 : vector<8x128xf32> to vector<1x1x8x128xf32>
    tpu.vector_store %arg4[%c0_22, %c1_23, %c0_24, %c0_25], %45 {strides = array<i32>} : memref<1x3x8x128xf32, #tpu.memory_space<vmem>>, vector<1x1x8x128xf32>,
    %c0_26 = arith.constant 0 : index
    %c2 = arith.constant 2 : index
    %c0_27 = arith.constant 0 : index
    %c0_28 = arith.constant 0 : index
    %46 = vector.load %arg4[%c0_26, %c2, %c0_27, %c0_28] : memref<1x3x8x128xf32, #tpu.memory_space<vmem>>, vector<1x1x8x128xf32>
    %47 = vector.shape_cast %46 : vector<1x1x8x128xf32> to vector<8x128xf32>
    %48 = arith.addf %47, %33 : vector<8x128xf32>
    %c0_29 = arith.constant 0 : index
    %c2_30 = arith.constant 2 : index
    %c0_31 = arith.constant 0 : index
    %c0_32 = arith.constant 0 : index
    %49 = vector.load %arg4[%c0_29, %c2_30, %c0_31, %c0_32] : memref<1x3x8x128xf32, #tpu.memory_space<vmem>>, vector<1x1x8x128xf32>
    %50 = vector.shape_cast %49 : vector<1x1x8x128xf32> to vector<8x128xf32>
    %51 = vector.shape_cast %48 : vector<8x128xf32> to vector<1x1x8x128xf32>
    tpu.vector_store %arg4[%c0_29, %c2_30, %c0_31, %c0_32], %51 {strides = array<i32>} : memref<1x3x8x128xf32, #tpu.memory_space<vmem>>, vector<1x1x8x128xf32>,
    return
  }
  func.func @transform_0(%arg0: i32, %arg1: i32) -> (i32, i32) {
    %c1_i32 = arith.constant 1 : i32
    %0 = arith.muli %arg0, %c1_i32 : i32
    %1 = arith.addi %0, %arg1 : i32
    %c0_i32 = arith.constant 0 : i32
    %c0_i32_0 = arith.constant 0 : i32
    return %1, %c0_i32 : i32, i32
  }
  func.func @transform_1(%arg0: i32, %arg1: i32) -> (i32, i32) {
    %c1_i32 = arith.constant 1 : i32
    %0 = arith.muli %arg0, %c1_i32 : i32
    %1 = arith.addi %0, %arg1 : i32
    %c0_i32 = arith.constant 0 : i32
    %c0_i32_0 = arith.constant 0 : i32
    return %1, %c0_i32 : i32, i32
  }
  func.func @transform_2(%arg0: i32, %arg1: i32) -> (i32, i32, i32, i32) {
    %c0_i32 = arith.constant 0 : i32
    %c0_i32_0 = arith.constant 0 : i32
    %c0_i32_1 = arith.constant 0 : i32
    %c0_i32_2 = arith.constant 0 : i32
    return %arg0, %c0_i32, %c0_i32_0, %c0_i32_1 : i32, i32, i32, i32
  }
}

</mosaic_0001>

<bundles_post_ra>
// kernel: tpu_custom_call.1
= control target key start
LH: loop header
LB: loop body
LE: loop exit
PB: predicated region body
PF: predicated region fallthrough
CT: control target
= control target key end

     0   :  { %7 = vsyncpa [#allocation3], 0  ;;  %s290_s0 = inlined_call_operand.hbm [shape: f32[16,128], index: 0, kind: input, shape index: {}]   ;;  %s291_s1 = inlined_call_operand.hbm [shape: s8[16,128], index: 1, kind: input, shape index: {}]   ;;  %s292_s2 = inlined_call_operand.hbm [shape: f32[1,3,8,128], index: 2, kind: output, shape index: {}]  }
   0x1   :  { %8 = vsyncpa [#allocation6], 0 }
   0x2   :  { %9 = vsyncpa [#allocation4], 0  ;;  %s226_s9 = smov [#allocation2]   ;;  %s154_s13 = scalar_lea.hbm %s290_s0, 256 }
   0x3   :  { %s19_s10 = sshll.u32 %s226_s9, 4  ;;  %p155_p0 = scmp.ne.s32.totalorder %s290_s0, %s154_s13  ;;  %s20_s10 = int_to_ptr.vmem [resolvable:$true] %s19_s10 }
   0x4   :  { %p158_p1 = scmp.lt.u32.totalorder %s154_s13, %s290_s0 }
   0x6   :  { %p160_p2 = pnand %p158_p1, %p155_p0 }
   0x8   :  { %163 = shalt.err (!%p160_p2)
}
   0x9   :  { %s164_s18 = scalar_lea.vmem %s20_s10, 256  ;;  %p169_p4 = scmp.lt.s32.totalorder %s20_s10, %s20_s10 }
   0xa   :  { %p165_p3 = scmp.ne.s32.totalorder %s20_s10, %s164_s18  ;;  %p170_p5 = scmp.lt.s32.totalorder %s164_s18, %s164_s18 }
   0xc   :  { %p171_p6 = por %p170_p5, %p169_p4 }
   0xe   :  { %p172_p7 = pnand %p171_p6, %p165_p3 }
  0x10   :  { %175 = shalt.err (!%p172_p7)
}
  0x11   :  { %s227_s19 = smov 128   ;;  %s228_s20 = smov 8  }
  0x12   :  { %25 = dma.hbm_to_vmem [thread:$0]  %s290_s0, 256, %s20_s10, [#allocation3], %s227_s19, %s227_s19, %s228_s20  }
  0x13   :  { %s229_s23 = smov [#allocation5]   ;;  %s176_s27 = scalar_lea.hbm %s291_s1, 64 }
  0x14   :  { %s35_s24 = sshll.u32 %s229_s23, 4  ;;  %p177_p8 = scmp.ne.s32.totalorder %s291_s1, %s176_s27  ;;  %s36_s24 = int_to_ptr.vmem [resolvable:$true] %s35_s24 }
  0x15   :  { %p180_p9 = scmp.lt.u32.totalorder %s176_s27, %s291_s1 }
  0x17   :  { %p182_p10 = pnand %p180_p9, %p177_p8 }
  0x19   :  { %185 = shalt.err (!%p182_p10)
}
  0x1a   :  { %s186_s4 = scalar_lea.vmem %s36_s24, 64  ;;  %p191_p12 = scmp.lt.s32.totalorder %s36_s24, %s36_s24 }
  0x1b   :  { %p187_p11 = scmp.ne.s32.totalorder %s36_s24, %s186_s4  ;;  %p192_p13 = scmp.lt.s32.totalorder %s186_s4, %s186_s4 }
  0x1d   :  { %p193_p0 = por %p192_p13, %p191_p12 }
  0x1f   :  { %p194_p1 = pnand %p193_p0, %p187_p11 }
  0x21   :  { %197 = shalt.err (!%p194_p1)
}
  0x22   :  { %s230_s0 = smov 32   ;;  %s231_s5 = smov 2  }
  0x23   :  { %41 = dma.hbm_to_vmem [thread:$0]  %s291_s1, 64, %s36_s24, [#allocation6], %s230_s0, %s230_s0, %s231_s5  }
  0x24   :  { %220 = dma.done.wait [#allocation3], 256  }
  0x25   :  { %221 = vsyncadd [#allocation3], 4294967040 }
  0x26   :  { %222 = dma.done.wait [#allocation6], 64  }
  0x27   :  { %223 = vsyncadd [#allocation6], 4294967232  ;;  %v59_v0 = vld [vmem:[#allocation2] sm:$0xff]  ;;  %v60_v1 = vld [vmem:[#allocation2 + $0x8] sm:$0xff]  ;;  %s232_s1 = smov [#allocation7]  }
  0x28   :  { %v139_v2 = vld [vmem:[#allocation5] sm:$0xf]   ;;  %v136_v5 = vadd.f32 -1.0, %v59_v0  ;;  %v137_v6 = vadd.f32 -1.0, %v60_v1  ;;  %v71_v7 = vsub.f32 0.0, %v59_v0  ;;  %v72_v8 = vsub.f32 0.0, %v60_v1 }
  0x29   :  { %v140_v3 = vunpack.c.0.s8 %v139_v2  ;;  %v141_v4 = vunpack.c.1.s8 %v139_v2  ;;  %s123_s8 = sshll.u32 %s232_s1, 4  ;;  %s124_s8 = int_to_ptr.vmem [resolvable:$true] %s123_s8 }
  0x2a   :  { %s198_s9 = scalar_lea.vmem %s124_s8, 384  ;;  %p203_p3 = scmp.lt.s32.totalorder %s124_s8, %s124_s8 }
  0x2b   :  { %v65_v9 = vcvt.s32.f32 %v140_v3  ;;  %v66_v10 = vcvt.s32.f32 %v141_v4  ;;  %p199_p2 = scmp.ne.s32.totalorder %s124_s8, %s198_s9  ;;  %p204_p4 = scmp.lt.s32.totalorder %s198_s9, %s198_s9 }
  0x2d   :  { %vm67_vm0 = vcmp.gt.f32.partialorder %v65_v9, 0.5  ;;  %vm68_vm1 = vcmp.gt.f32.partialorder %v66_v10, 0.5  ;;  %v99_v11 = vmul.f32 %v65_v9, %v59_v0  ;;  %v100_v12 = vmul.f32 %v66_v10, %v60_v1  ;;  %p205_p5 = por %p204_p4, %p203_p3 }
  0x2e   :  { %v73_v13 = vsel %vm67_vm0, %v136_v5, %v71_v7  ;;  %v74_v14 = vsel %vm68_vm1, %v137_v6, %v72_v8  ;;  %v103_v15 = vadd.f32 %v65_v9, %v59_v0  ;;  %v104_v16 = vadd.f32 %v66_v10, %v60_v1 }
  0x2f   :  { %v75_v17 = vadd.f32 1.0, %v73_v13  ;;  %v84_v18 = vadd.f32 1.0, %v74_v14  ;;  %v101_v19 = vadd.f32 %v100_v12, %v99_v11  ;;  %v78_v21 = vmul.f32 -0.5, %v73_v13  ;;  %p206_p6 = pnand %p205_p5, %p199_p2 }
  0x30   :  { %v105_v20 = vadd.f32 %v104_v16, %v103_v15  ;;  %v87_v22 = vmul.f32 -0.5, %v74_v14  ;;  %v81_v24 = vand.u32 2147483647, %v73_v13  ;;  %v90_v26 = vand.u32 2147483647, %v74_v14 }
  0x31   :  { %150 = vlog2.f32 %v75_v17  ;;  %113 = vst [vmem:[#allocation7 + $0x8] sm:$0xff] %v101_v19  ;;  %v79_v23 = vadd.f32 1.0, %v78_v21 }
  0x32   :  { %152 = vlog2.f32 %v84_v18  ;;  %117 = vst [vmem:[#allocation7 + $0x10] sm:$0xff] %v105_v20  ;;  %v88_v25 = vadd.f32 1.0, %v87_v22  ;;  %vm82_vm2 = vcmp.lt.f32.partialorder %v81_v24, 0.0004427343  ;;  %vm91_vm3 = vcmp.lt.f32.partialorder %v90_v26, 0.0004427343 }
  0x33   :  { %v80_v27 = vmul.f32 %v79_v23, %v73_v13 }
  0x34   :  { %v89_v29 = vmul.f32 %v88_v25, %v74_v14 }
  0x3b   :  { %v151_v28 = vpop.eup %150 }
  0x3c   :  { %v153_v30 = vpop.eup %152  ;;  %v77_v31 = vmul.f32 0.6931472, %v151_v28 }
  0x3d   :  { %v86_v32 = vmul.f32 0.6931472, %v153_v30 }
  0x3e   :  { %v83_v33 = vsel %vm82_vm2, %v80_v27, %v77_v31 }
  0x3f   :  { %v92_v34 = vsel %vm91_vm3, %v89_v29, %v86_v32  ;;  %v93_v35 = vmax.f32 %v83_v33, -100.0 }
  0x40   :  { %v94_v36 = vmax.f32 %v92_v34, -100.0 }
  0x41   :  { %v95_v37 = vsub.f32 0.0, %v93_v35 }
  0x42   :  { %v96_v38 = vsub.f32 0.0, %v94_v36 }
  0x44   :  { %v97_v39 = vadd.f32 %v96_v38, %v95_v37 }
  0x46   :  { %109 = vst [vmem:[#allocation7] sm:$0xff] %v97_v39 }
  0x47   :  { %209 = shalt.err (!%p206_p6)
}
  0x48   :  { %s210_s12 = scalar_lea.hbm %s292_s2, 384 }
  0x49   :  { %p211_p7 = scmp.ne.s32.totalorder %s292_s2, %s210_s12  ;;  %p214_p8 = scmp.lt.u32.totalorder %s210_s12, %s292_s2 }
  0x4b   :  { %p216_p9 = pnand %p214_p8, %p211_p7 }
  0x4d   :  { %219 = shalt.err (!%p216_p9)
}
  0x4e   :  { %129 = dma.vmem_to_hbm [thread:$0]  %s124_s8, 384, %s292_s2, [#allocation4], %s227_s19, %s227_s19, %s228_s20  }
  0x4f   :  { %224 = dma.done.wait [#allocation4], 384  }
  0x50   :  { %225 = vsyncadd [#allocation4], 4294966912 }
  0x51   :  { %133 = vsyncpa [#allocation3], 1 }
  0x52   :  { %134 = vsyncpa [#allocation6], 1 }
  0x53   :  { %135 = vsyncpa [#allocation4], 1 }

</bundles_post_ra>
